<compile_context>
chip_gen: v6e
topology: v6e:2x2x1
jax: 0.10.0
libtpu: 0.0.40
codegen_flags: <defaults>
</compile_context>

<pallas_src>
import jax
import jax.numpy as jnp
from jax.experimental import pallas as pl
from jax.experimental.pallas import tpu as pltpu

_LANES = 128
_SEGMENTS = 2                                     # leading "parallel" grid axis (2 TCs on v7x)
_NEG_BIG = float(jnp.finfo(jnp.float32).min)      # finite stand-in for -inf (no NaN rescales)


def _ceil_div(a, b):
    return -(-a // b)


def _round_up(a, b):
    return _ceil_div(a, b) * b


def _make_kernel(n_valid, tile_rows, tiles_per_seg):
    tb = tile_rows

    def kernel(preds_ref, labels_ref, out_ref,
               m0_ref, m1_ref, s0_ref, s1_ref, ps_ref, c1_ref):
        seg = pl.program_id(0)
        i = pl.program_id(1)

        @pl.when(i == 0)
        def _init():
            m0_ref[...] = jnp.full((1, 1), _NEG_BIG, jnp.float32)
            m1_ref[...] = jnp.full((1, 1), _NEG_BIG, jnp.float32)
            s0_ref[...] = jnp.zeros((1, 1), jnp.float32)
            s1_ref[...] = jnp.zeros((1, 1), jnp.float32)
            ps_ref[...] = jnp.zeros((1, 1), jnp.float32)
            c1_ref[...] = jnp.zeros((1, 1), jnp.float32)

        # Native-dtype DMA; cast to f32 after load.
        p0 = preds_ref[0].astype(jnp.float32)          # (tb, 128)  class-0 logits
        p1 = preds_ref[1].astype(jnp.float32)          # (tb, 128)  class-1 logits
        labels = labels_ref[...]                       # (tb, 128)  int32

        # Validity mask for tail padding (sample index < N).
        row_io = jax.lax.broadcasted_iota(jnp.int32, (tb, _LANES), 0)
        lane_io = jax.lax.broadcasted_iota(jnp.int32, (tb, _LANES), 1)
        base = (seg * tiles_per_seg + i) * (tb * _LANES)
        sample = base + row_io * _LANES + lane_io
        valid = sample < n_valid

        # --- per-column (per-class) online max + rescaled exp-sum ---
        p0m = jnp.where(valid, p0, _NEG_BIG)
        p1m = jnp.where(valid, p1, _NEG_BIG)
        t0 = jnp.max(p0m, keepdims=True)               # (1, 1)
        t1 = jnp.max(p1m, keepdims=True)               # (1, 1)

        m0_old = m0_ref[...]
        m1_old = m1_ref[...]
        m0_new = jnp.maximum(m0_old, t0)
        m1_new = jnp.maximum(m1_old, t1)

        e0 = jnp.where(valid, jnp.exp(p0 - m0_new), 0.0)
        e1 = jnp.where(valid, jnp.exp(p1 - m1_new), 0.0)

        s0_ref[...] = s0_ref[...] * jnp.exp(m0_old - m0_new) + jnp.sum(e0, keepdims=True)
        s1_ref[...] = s1_ref[...] * jnp.exp(m1_old - m1_new) + jnp.sum(e1, keepdims=True)
        m0_ref[...] = m0_new
        m1_ref[...] = m1_new

        # --- picked-logit sum + label==1 count (replaces explicit one-hot / log) ---
        lbl1 = labels == 1
        picked = jnp.where(lbl1, p1, p0)
        ps_ref[...] += jnp.sum(jnp.where(valid, picked, 0.0), keepdims=True)
        c1_ref[...] += jnp.sum(jnp.where(jnp.logical_and(valid, lbl1), 1.0, 0.0),
                               keepdims=True)

        # --- emit this segment's partial stats on its last tile ---
        @pl.when(i == tiles_per_seg - 1)
        def _finalize():
            lane = jax.lax.broadcasted_iota(jnp.int32, (8, _LANES), 1)
            row = jnp.zeros((8, _LANES), jnp.float32)
            row = jnp.where(lane == 0, m0_ref[...], row)
            row = jnp.where(lane == 1, m1_ref[...], row)
            row = jnp.where(lane == 2, s0_ref[...], row)
            row = jnp.where(lane == 3, s1_ref[...], row)
            row = jnp.where(lane == 4, ps_ref[...], row)
            row = jnp.where(lane == 5, c1_ref[...], row)
            out_ref[...] = row

    return kernel


def cross_entropy(preds, labels, *, block_rows=512):
    """preds: (N, 2) float, labels: (N,) int in {0, 1}. Returns scalar f32 loss."""
    n, c = preds.shape
    assert c == 2, "module hard-codes 2 classes"
    assert block_rows % 8 == 0

    if preds.dtype == jnp.float64:
        preds = preds.astype(jnp.float32)
    labels = labels.astype(jnp.int32)

    # ---- lane-dense, padded layout ----
    rows_min = _ceil_div(n, _LANES)                       # rows of 128 samples
    rows_per_seg_min = _ceil_div(rows_min, _SEGMENTS)
    tb = max(8, min(block_rows, _round_up(rows_per_seg_min, 8)))
    tiles_per_seg = max(1, _ceil_div(rows_per_seg_min, tb))
    rows_total = _SEGMENTS * tiles_per_seg * tb
    total = rows_total * _LANES                           # padded sample count

    preds_t = jnp.pad(preds.T, ((0, 0), (0, total - n)))  # (2, total), class-major
    preds_t = preds_t.reshape(2, rows_total, _LANES)      # lane-dense, native dtype
    labels_p = jnp.pad(labels, (0, total - n)).reshape(rows_total, _LANES)

    kernel = _make_kernel(n, tb, tiles_per_seg)

    bytes_accessed = int(preds_t.size * preds_t.dtype.itemsize
                         + labels_p.size * 4 + _SEGMENTS * 8 * _LANES * 4)
    cost = pl.CostEstimate(flops=12 * total,
                           transcendentals=2 * total + 4,
                           bytes_accessed=bytes_accessed)

    raw = pl.pallas_call(
        kernel,
        out_shape=jax.ShapeDtypeStruct((_SEGMENTS * 8, _LANES), jnp.float32),
        grid=(_SEGMENTS, tiles_per_seg),
        in_specs=[
            pl.BlockSpec((2, tb, _LANES), lambda s, i: (0, s * tiles_per_seg + i, 0)),
            pl.BlockSpec((tb, _LANES), lambda s, i: (s * tiles_per_seg + i, 0)),
        ],
        out_specs=pl.BlockSpec((8, _LANES), lambda s, i: (s, 0)),
        scratch_shapes=[pltpu.VMEM((1, 1), jnp.float32)] * 6,
        compiler_params=pltpu.CompilerParams(
            dimension_semantics=("parallel", "arbitrary"),
            vmem_limit_bytes=32 * 1024 * 1024),
        cost_estimate=cost,
    )(preds_t, labels_p)

    # ---- tiny epilogue: combine the per-segment partial stats ----
    stats = raw.reshape(_SEGMENTS, 8, _LANES)[:, 0, :]    # (SEG, 128)
    m = stats[:, 0:2]                                     # per-class running maxes
    s = stats[:, 2:4]                                     # rescaled per-class exp-sums
    ps = stats[:, 4]                                      # picked-logit sums
    c1 = stats[:, 5]                                      # label==1 counts

    m_fin = jnp.max(m, axis=0)                            # (2,) true per-column max
    s_fin = jnp.sum(s * jnp.exp(m - m_fin[None, :]), axis=0)
    big_s = s_fin[0] + s_fin[1]                           # global exp-sum
    c1_tot = jnp.sum(c1)
    c0_tot = jnp.float32(n) - c1_tot
    picked_adj = jnp.sum(ps) - c0_tot * m_fin[0] - c1_tot * m_fin[1]
    return jnp.log(big_s) - picked_adj / jnp.float32(n)


def _reference(preds, labels):
    """Pure-JAX reference mirroring the exact PyTorch code path."""
    preds = preds.astype(jnp.float32)
    one_hot = jax.nn.one_hot(labels, 2, dtype=jnp.float32)
    col_max = jnp.max(preds, axis=0, keepdims=True)
    e_x = jnp.exp(preds - col_max)
    sm = e_x / jnp.sum(e_x)
    return -jnp.sum(one_hot * jnp.log(sm)) / preds.shape[0]


if __name__ == "__main__":
    key = jax.random.PRNGKey(0)
    kp, kl, kp2, kl2 = jax.random.split(key, 4)

    # Small case consistent with the 2-class module.
    N = 8
    preds = jax.random.normal(kp, (N, 2), dtype=jnp.float32)
    labels = jax.random.randint(kl, (N,), 0, 2, dtype=jnp.int32)
    loss = jax.block_until_ready(cross_entropy(preds, labels))
    ref = jax.block_until_ready(_reference(preds, labels))
    assert jnp.allclose(loss, ref, rtol=1e-5, atol=1e-5), (loss, ref)

    # Larger case with small tiles: exercises multi-tile online rescaling + tail masking.
    N2 = 3000
    preds2 = jax.random.normal(kp2, (N2, 2), dtype=jnp.float32) * 3.0
    labels2 = jax.random.randint(kl2, (N2,), 0, 2, dtype=jnp.int32)
    loss2 = jax.block_until_ready(cross_entropy(preds2, labels2, block_rows=8))
    ref2 = jax.block_until_ready(_reference(preds2, labels2))
    assert jnp.allclose(loss2, ref2, rtol=1e-4, atol=1e-4), (loss2, ref2)

    print("KERNEL_OK")
</pallas_src>

<mosaic_0001>
module attributes {stable_mosaic.version = 11 : i64} {
  func.func @kernel(%arg0: i32, %arg1: i32, %arg2: memref<2x8x128xf32, #tpu.memory_space<vmem>>, %arg3: memref<8x128xi32, #tpu.memory_space<vmem>>, %arg4: memref<8x128xf32, #tpu.memory_space<vmem>>, %arg5: memref<1x1xf32, #tpu.memory_space<vmem>>, %arg6: memref<1x1xf32, #tpu.memory_space<vmem>>, %arg7: memref<1x1xf32, #tpu.memory_space<vmem>>, %arg8: memref<1x1xf32, #tpu.memory_space<vmem>>, %arg9: memref<1x1xf32, #tpu.memory_space<vmem>>, %arg10: memref<1x1xf32, #tpu.memory_space<vmem>>) attributes {dimension_semantics = [#tpu.dimension_semantics<parallel>, #tpu.dimension_semantics<arbitrary>], iteration_bounds = array<i64: 2, 1>, scalar_prefetch = 0 : i64, scratch_operands = 6 : i64, tpu.core_type = #tpu.core_type<tc>, window_params = [{transform_indices = @transform_0, window_bounds = array<i64: 2, 8, 128>}, {transform_indices = @transform_1, window_bounds = array<i64: 8, 128>}, {transform_indices = @transform_2, window_bounds = array<i64: 8, 128>}]} {
    %c0_i32 = arith.constant 0 : i32
    %0 = arith.cmpi eq, %arg1, %c0_i32 : i32
    %1 = arith.extui %0 : i1 to i32
    %c0_i32_0 = arith.constant 0 : i32
    %2 = arith.cmpi ne, %1, %c0_i32_0 : i32
    scf.if %2 {
      %cst_46 = arith.constant -3.40282347E+38 : f32
      %100 = vector.broadcast %cst_46 : f32 to vector<1x1xf32>
      %c0_47 = arith.constant 0 : index
      %c0_48 = arith.constant 0 : index
      %101 = vector.load %arg5[%c0_47, %c0_48] : memref<1x1xf32, #tpu.memory_space<vmem>>, vector<1x1xf32>
      tpu.vector_store %arg5[%c0_47, %c0_48], %100 {strides = array<i32>} : memref<1x1xf32, #tpu.memory_space<vmem>>, vector<1x1xf32>,
      %cst_49 = arith.constant -3.40282347E+38 : f32
      %102 = vector.broadcast %cst_49 : f32 to vector<1x1xf32>
      %c0_50 = arith.constant 0 : index
      %c0_51 = arith.constant 0 : index
      %103 = vector.load %arg6[%c0_50, %c0_51] : memref<1x1xf32, #tpu.memory_space<vmem>>, vector<1x1xf32>
      tpu.vector_store %arg6[%c0_50, %c0_51], %102 {strides = array<i32>} : memref<1x1xf32, #tpu.memory_space<vmem>>, vector<1x1xf32>,
      %cst_52 = arith.constant 0.000000e+00 : f32
      %104 = vector.broadcast %cst_52 : f32 to vector<1x1xf32>
      %c0_53 = arith.constant 0 : index
      %c0_54 = arith.constant 0 : index
      %105 = vector.load %arg7[%c0_53, %c0_54] : memref<1x1xf32, #tpu.memory_space<vmem>>, vector<1x1xf32>
      tpu.vector_store %arg7[%c0_53, %c0_54], %104 {strides = array<i32>} : memref<1x1xf32, #tpu.memory_space<vmem>>, vector<1x1xf32>,
      %cst_55 = arith.constant 0.000000e+00 : f32
      %106 = vector.broadcast %cst_55 : f32 to vector<1x1xf32>
      %c0_56 = arith.constant 0 : index
      %c0_57 = arith.constant 0 : index
      %107 = vector.load %arg8[%c0_56, %c0_57] : memref<1x1xf32, #tpu.memory_space<vmem>>, vector<1x1xf32>
      tpu.vector_store %arg8[%c0_56, %c0_57], %106 {strides = array<i32>} : memref<1x1xf32, #tpu.memory_space<vmem>>, vector<1x1xf32>,
      %cst_58 = arith.constant 0.000000e+00 : f32
      %108 = vector.broadcast %cst_58 : f32 to vector<1x1xf32>
      %c0_59 = arith.constant 0 : index
      %c0_60 = arith.constant 0 : index
      %109 = vector.load %arg9[%c0_59, %c0_60] : memref<1x1xf32, #tpu.memory_space<vmem>>, vector<1x1xf32>
      tpu.vector_store %arg9[%c0_59, %c0_60], %108 {strides = array<i32>} : memref<1x1xf32, #tpu.memory_space<vmem>>, vector<1x1xf32>,
      %cst_61 = arith.constant 0.000000e+00 : f32
      %110 = vector.broadcast %cst_61 : f32 to vector<1x1xf32>
      %c0_62 = arith.constant 0 : index
      %c0_63 = arith.constant 0 : index
      %111 = vector.load %arg10[%c0_62, %c0_63] : memref<1x1xf32, #tpu.memory_space<vmem>>, vector<1x1xf32>
      tpu.vector_store %arg10[%c0_62, %c0_63], %110 {strides = array<i32>} : memref<1x1xf32, #tpu.memory_space<vmem>>, vector<1x1xf32>,
    } else {
    }
    %c0 = arith.constant 0 : index
    %c0_1 = arith.constant 0 : index
    %c0_2 = arith.constant 0 : index
    %3 = vector.load %arg2[%c0, %c0_1, %c0_2] : memref<2x8x128xf32, #tpu.memory_space<vmem>>, vector<1x8x128xf32>
    %4 = vector.shape_cast %3 : vector<1x8x128xf32> to vector<8x128xf32>
    %c1 = arith.constant 1 : index
    %c0_3 = arith.constant 0 : index
    %c0_4 = arith.constant 0 : index
    %5 = vector.load %arg2[%c1, %c0_3, %c0_4] : memref<2x8x128xf32, #tpu.memory_space<vmem>>, vector<1x8x128xf32>
    %6 = vector.shape_cast %5 : vector<1x8x128xf32> to vector<8x128xf32>
    %c0_5 = arith.constant 0 : index
    %c0_6 = arith.constant 0 : index
    %7 = vector.load %arg3[%c0_5, %c0_6] : memref<8x128xi32, #tpu.memory_space<vmem>>, vector<8x128xi32>
    %8 = tpu.iota {dimensions = array<i32: 0>} : vector<8x128xi32>
    %9 = tpu.iota {dimensions = array<i32: 1>} : vector<8x128xi32>
    %c1_i32 = arith.constant 1 : i32
    %10 = arith.muli %arg0, %c1_i32 : i32
    %11 = arith.addi %10, %arg1 : i32
    %c1024_i32 = arith.constant 1024 : i32
    %12 = arith.muli %11, %c1024_i32 : i32
    %c128_i32 = arith.constant 128 : i32
    %13 = vector.broadcast %c128_i32 : i32 to vector<8x128xi32>
    %14 = arith.muli %8, %13 : vector<8x128xi32>
    %15 = vector.broadcast %12 : i32 to vector<8x128xi32>
    %16 = arith.addi %15, %14 : vector<8x128xi32>
    %17 = arith.addi %16, %9 : vector<8x128xi32>
    %c8_i32 = arith.constant 8 : i32
    %18 = vector.broadcast %c8_i32 : i32 to vector<8x128xi32>
    %19 = arith.cmpi slt, %17, %18 : vector<8x128xi32>
    %cst = arith.constant -3.40282347E+38 : f32
    %20 = vector.broadcast %cst : f32 to vector<8x128xf32>
    %21 = arith.select %19, %4, %20 : vector<8x128xi1>, vector<8x128xf32>
    %cst_7 = arith.constant -3.40282347E+38 : f32
    %22 = vector.broadcast %cst_7 : f32 to vector<8x128xf32>
    %23 = arith.select %19, %6, %22 : vector<8x128xi1>, vector<8x128xf32>
    %24 = vector.shape_cast %21 : vector<8x128xf32> to vector<1x8x128xf32>
    %cst_8 = arith.constant dense<0xFF800000> : vector<1xf32>
    %25 = vector.multi_reduction <maximumf>, %24, %cst_8 [1, 2] : vector<1x8x128xf32> to vector<1xf32>
    %26 = vector.shape_cast %25 : vector<1xf32> to vector<1x1x1xf32>
    %27 = vector.extract %26[0, 0, 0] : f32 from vector<1x1x1xf32>
    %28 = vector.broadcast %27 : f32 to vector<1x1xf32>
    %29 = vector.shape_cast %23 : vector<8x128xf32> to vector<1x8x128xf32>
    %cst_9 = arith.constant dense<0xFF800000> : vector<1xf32>
    %30 = vector.multi_reduction <maximumf>, %29, %cst_9 [1, 2] : vector<1x8x128xf32> to vector<1xf32>
    %31 = vector.shape_cast %30 : vector<1xf32> to vector<1x1x1xf32>
    %32 = vector.extract %31[0, 0, 0] : f32 from vector<1x1x1xf32>
    %33 = vector.broadcast %32 : f32 to vector<1x1xf32>
    %c0_10 = arith.constant 0 : index
    %c0_11 = arith.constant 0 : index
    %34 = vector.load %arg5[%c0_10, %c0_11] : memref<1x1xf32, #tpu.memory_space<vmem>>, vector<1x1xf32>
    %c0_12 = arith.constant 0 : index
    %c0_13 = arith.constant 0 : index
    %35 = vector.load %arg6[%c0_12, %c0_13] : memref<1x1xf32, #tpu.memory_space<vmem>>, vector<1x1xf32>
    %36 = arith.maximumf %34, %28 : vector<1x1xf32>
    %37 = arith.maximumf %35, %33 : vector<1x1xf32>
    %38 = vector.broadcast %36 : vector<1x1xf32> to vector<8x128xf32>
    %39 = arith.subf %4, %38 : vector<8x128xf32>
    %40 = math.exp %39 : vector<8x128xf32>
    %cst_14 = arith.constant 0.000000e+00 : f32
    %41 = vector.broadcast %cst_14 : f32 to vector<8x128xf32>
    %42 = arith.select %19, %40, %41 : vector<8x128xi1>, vector<8x128xf32>
    %43 = vector.broadcast %37 : vector<1x1xf32> to vector<8x128xf32>
    %44 = arith.subf %6, %43 : vector<8x128xf32>
    %45 = math.exp %44 : vector<8x128xf32>
    %cst_15 = arith.constant 0.000000e+00 : f32
    %46 = vector.broadcast %cst_15 : f32 to vector<8x128xf32>
    %47 = arith.select %19, %45, %46 : vector<8x128xi1>, vector<8x128xf32>
    %c0_16 = arith.constant 0 : index
    %c0_17 = arith.constant 0 : index
    %48 = vector.load %arg7[%c0_16, %c0_17] : memref<1x1xf32, #tpu.memory_space<vmem>>, vector<1x1xf32>
    %49 = arith.subf %34, %36 : vector<1x1xf32>
    %50 = math.exp %49 : vector<1x1xf32>
    %51 = arith.mulf %48, %50 : vector<1x1xf32>
    %52 = vector.shape_cast %42 : vector<8x128xf32> to vector<1x8x128xf32>
    %cst_18 = arith.constant dense<0.000000e+00> : vector<1xf32>
    %53 = vector.multi_reduction <add>, %52, %cst_18 [1, 2] : vector<1x8x128xf32> to vector<1xf32>
    %54 = vector.shape_cast %53 : vector<1xf32> to vector<1x1x1xf32>
    %55 = vector.extract %54[0, 0, 0] : f32 from vector<1x1x1xf32>
    %56 = vector.broadcast %55 : f32 to vector<1x1xf32>
    %57 = arith.addf %51, %56 : vector<1x1xf32>
    %c0_19 = arith.constant 0 : index
    %c0_20 = arith.constant 0 : index
    %58 = vector.load %arg7[%c0_19, %c0_20] : memref<1x1xf32, #tpu.memory_space<vmem>>, vector<1x1xf32>
    tpu.vector_store %arg7[%c0_19, %c0_20], %57 {strides = array<i32>} : memref<1x1xf32, #tpu.memory_space<vmem>>, vector<1x1xf32>,
    %c0_21 = arith.constant 0 : index
    %c0_22 = arith.constant 0 : index
    %59 = vector.load %arg8[%c0_21, %c0_22] : memref<1x1xf32, #tpu.memory_space<vmem>>, vector<1x1xf32>
    %60 = arith.subf %35, %37 : vector<1x1xf32>
    %61 = math.exp %60 : vector<1x1xf32>
    %62 = arith.mulf %59, %61 : vector<1x1xf32>
    %63 = vector.shape_cast %47 : vector<8x128xf32> to vector<1x8x128xf32>
    %cst_23 = arith.constant dense<0.000000e+00> : vector<1xf32>
    %64 = vector.multi_reduction <add>, %63, %cst_23 [1, 2] : vector<1x8x128xf32> to vector<1xf32>
    %65 = vector.shape_cast %64 : vector<1xf32> to vector<1x1x1xf32>
    %66 = vector.extract %65[0, 0, 0] : f32 from vector<1x1x1xf32>
    %67 = vector.broadcast %66 : f32 to vector<1x1xf32>
    %68 = arith.addf %62, %67 : vector<1x1xf32>
    %c0_24 = arith.constant 0 : index
    %c0_25 = arith.constant 0 : index
    %69 = vector.load %arg8[%c0_24, %c0_25] : memref<1x1xf32, #tpu.memory_space<vmem>>, vector<1x1xf32>
    tpu.vector_store %arg8[%c0_24, %c0_25], %68 {strides = array<i32>} : memref<1x1xf32, #tpu.memory_space<vmem>>, vector<1x1xf32>,
    %c0_26 = arith.constant 0 : index
    %c0_27 = arith.constant 0 : index
    %70 = vector.load %arg5[%c0_26, %c0_27] : memref<1x1xf32, #tpu.memory_space<vmem>>, vector<1x1xf32>
    tpu.vector_store %arg5[%c0_26, %c0_27], %36 {strides = array<i32>} : memref<1x1xf32, #tpu.memory_space<vmem>>, vector<1x1xf32>,
    %c0_28 = arith.constant 0 : index
    %c0_29 = arith.constant 0 : index
    %71 = vector.load %arg6[%c0_28, %c0_29] : memref<1x1xf32, #tpu.memory_space<vmem>>, vector<1x1xf32>
    tpu.vector_store %arg6[%c0_28, %c0_29], %37 {strides = array<i32>} : memref<1x1xf32, #tpu.memory_space<vmem>>, vector<1x1xf32>,
    %c1_i32_30 = arith.constant 1 : i32
    %72 = vector.broadcast %c1_i32_30 : i32 to vector<8x128xi32>
    %73 = arith.cmpi eq, %7, %72 : vector<8x128xi32>
    %74 = arith.select %73, %6, %4 : vector<8x128xi1>, vector<8x128xf32>
    %c0_31 = arith.constant 0 : index
    %c0_32 = arith.constant 0 : index
    %75 = vector.load %arg9[%c0_31, %c0_32] : memref<1x1xf32, #tpu.memory_space<vmem>>, vector<1x1xf32>
    %cst_33 = arith.constant 0.000000e+00 : f32
    %76 = vector.broadcast %cst_33 : f32 to vector<8x128xf32>
    %77 = arith.select %19, %74, %76 : vector<8x128xi1>, vector<8x128xf32>
    %78 = vector.shape_cast %77 : vector<8x128xf32> to vector<1x8x128xf32>
    %cst_34 = arith.constant dense<0.000000e+00> : vector<1xf32>
    %79 = vector.multi_reduction <add>, %78, %cst_34 [1, 2] : vector<1x8x128xf32> to vector<1xf32>
    %80 = vector.shape_cast %79 : vector<1xf32> to vector<1x1x1xf32>
    %81 = vector.extract %80[0, 0, 0] : f32 from vector<1x1x1xf32>
    %82 = vector.broadcast %81 : f32 to vector<1x1xf32>
    %83 = arith.addf %75, %82 : vector<1x1xf32>
    %c0_35 = arith.constant 0 : index
    %c0_36 = arith.constant 0 : index
    %84 = vector.load %arg9[%c0_35, %c0_36] : memref<1x1xf32, #tpu.memory_space<vmem>>, vector<1x1xf32>
    tpu.vector_store %arg9[%c0_35, %c0_36], %83 {strides = array<i32>} : memref<1x1xf32, #tpu.memory_space<vmem>>, vector<1x1xf32>,
    %c0_37 = arith.constant 0 : index
    %c0_38 = arith.constant 0 : index
    %85 = vector.load %arg10[%c0_37, %c0_38] : memref<1x1xf32, #tpu.memory_space<vmem>>, vector<1x1xf32>
    %86 = arith.andi %19, %73 : vector<8x128xi1>
    %cst_39 = arith.constant 1.000000e+00 : f32
    %cst_40 = arith.constant 0.000000e+00 : f32
    %87 = vector.broadcast %cst_39 : f32 to vector<8x128xf32>
    %88 = vector.broadcast %cst_40 : f32 to vector<8x128xf32>
    %89 = arith.select %86, %87, %88 : vector<8x128xi1>, vector<8x128xf32>
    %90 = vector.shape_cast %89 : vector<8x128xf32> to vector<1x8x128xf32>
    %cst_41 = arith.constant dense<0.000000e+00> : vector<1xf32>
    %91 = vector.multi_reduction <add>, %90, %cst_41 [1, 2] : vector<1x8x128xf32> to vector<1xf32>
    %92 = vector.shape_cast %91 : vector<1xf32> to vector<1x1x1xf32>
    %93 = vector.extract %92[0, 0, 0] : f32 from vector<1x1x1xf32>
    %94 = vector.broadcast %93 : f32 to vector<1x1xf32>
    %95 = arith.addf %85, %94 : vector<1x1xf32>
    %c0_42 = arith.constant 0 : index
    %c0_43 = arith.constant 0 : index
    %96 = vector.load %arg10[%c0_42, %c0_43] : memref<1x1xf32, #tpu.memory_space<vmem>>, vector<1x1xf32>
    tpu.vector_store %arg10[%c0_42, %c0_43], %95 {strides = array<i32>} : memref<1x1xf32, #tpu.memory_space<vmem>>, vector<1x1xf32>,
    %c0_i32_44 = arith.constant 0 : i32
    %97 = arith.cmpi eq, %arg1, %c0_i32_44 : i32
    %98 = arith.extui %97 : i1 to i32
    %c0_i32_45 = arith.constant 0 : i32
    %99 = arith.cmpi ne, %98, %c0_i32_45 : i32
    scf.if %99 {
      %100 = tpu.iota {dimensions = array<i32: 1>} : vector<8x128xi32>
      %cst_46 = arith.constant 0.000000e+00 : f32
      %101 = vector.broadcast %cst_46 : f32 to vector<8x128xf32>
      %c0_i32_47 = arith.constant 0 : i32
      %102 = vector.broadcast %c0_i32_47 : i32 to vector<8x128xi32>
      %103 = arith.cmpi eq, %100, %102 : vector<8x128xi32>
      %c0_48 = arith.constant 0 : index
      %c0_49 = arith.constant 0 : index
      %104 = vector.load %arg5[%c0_48, %c0_49] : memref<1x1xf32, #tpu.memory_space<vmem>>, vector<1x1xf32>
      %105 = vector.shape_cast %104 : vector<1x1xf32> to vector<1x1xf32>
      %106 = vector.broadcast %105 : vector<1x1xf32> to vector<8x128xf32>
      %107 = arith.select %103, %106, %101 : vector<8x128xi1>, vector<8x128xf32>
      %c1_i32_50 = arith.constant 1 : i32
      %108 = vector.broadcast %c1_i32_50 : i32 to vector<8x128xi32>
      %109 = arith.cmpi eq, %100, %108 : vector<8x128xi32>
      %c0_51 = arith.constant 0 : index
      %c0_52 = arith.constant 0 : index
      %110 = vector.load %arg6[%c0_51, %c0_52] : memref<1x1xf32, #tpu.memory_space<vmem>>, vector<1x1xf32>
      %111 = vector.shape_cast %110 : vector<1x1xf32> to vector<1x1xf32>
      %112 = vector.broadcast %111 : vector<1x1xf32> to vector<8x128xf32>
      %113 = arith.select %109, %112, %107 : vector<8x128xi1>, vector<8x128xf32>
      %c2_i32 = arith.constant 2 : i32
      %114 = vector.broadcast %c2_i32 : i32 to vector<8x128xi32>
      %115 = arith.cmpi eq, %100, %114 : vector<8x128xi32>
      %c0_53 = arith.constant 0 : index
      %c0_54 = arith.constant 0 : index
      %116 = vector.load %arg7[%c0_53, %c0_54] : memref<1x1xf32, #tpu.memory_space<vmem>>, vector<1x1xf32>
      %117 = vector.shape_cast %116 : vector<1x1xf32> to vector<1x1xf32>
      %118 = vector.broadcast %117 : vector<1x1xf32> to vector<8x128xf32>
      %119 = arith.select %115, %118, %113 : vector<8x128xi1>, vector<8x128xf32>
      %c3_i32 = arith.constant 3 : i32
      %120 = vector.broadcast %c3_i32 : i32 to vector<8x128xi32>
      %121 = arith.cmpi eq, %100, %120 : vector<8x128xi32>
      %c0_55 = arith.constant 0 : index
      %c0_56 = arith.constant 0 : index
      %122 = vector.load %arg8[%c0_55, %c0_56] : memref<1x1xf32, #tpu.memory_space<vmem>>, vector<1x1xf32>
      %123 = vector.shape_cast %122 : vector<1x1xf32> to vector<1x1xf32>
      %124 = vector.broadcast %123 : vector<1x1xf32> to vector<8x128xf32>
      %125 = arith.select %121, %124, %119 : vector<8x128xi1>, vector<8x128xf32>
      %c4_i32 = arith.constant 4 : i32
      %126 = vector.broadcast %c4_i32 : i32 to vector<8x128xi32>
      %127 = arith.cmpi eq, %100, %126 : vector<8x128xi32>
      %c0_57 = arith.constant 0 : index
      %c0_58 = arith.constant 0 : index
      %128 = vector.load %arg9[%c0_57, %c0_58] : memref<1x1xf32, #tpu.memory_space<vmem>>, vector<1x1xf32>
      %129 = vector.shape_cast %128 : vector<1x1xf32> to vector<1x1xf32>
      %130 = vector.broadcast %129 : vector<1x1xf32> to vector<8x128xf32>
      %131 = arith.select %127, %130, %125 : vector<8x128xi1>, vector<8x128xf32>
      %c5_i32 = arith.constant 5 : i32
      %132 = vector.broadcast %c5_i32 : i32 to vector<8x128xi32>
      %133 = arith.cmpi eq, %100, %132 : vector<8x128xi32>
      %c0_59 = arith.constant 0 : index
      %c0_60 = arith.constant 0 : index
      %134 = vector.load %arg10[%c0_59, %c0_60] : memref<1x1xf32, #tpu.memory_space<vmem>>, vector<1x1xf32>
      %135 = vector.shape_cast %134 : vector<1x1xf32> to vector<1x1xf32>
      %136 = vector.broadcast %135 : vector<1x1xf32> to vector<8x128xf32>
      %137 = arith.select %133, %136, %131 : vector<8x128xi1>, vector<8x128xf32>
      %c0_61 = arith.constant 0 : index
      %c0_62 = arith.constant 0 : index
      %138 = vector.load %arg4[%c0_61, %c0_62] : memref<8x128xf32, #tpu.memory_space<vmem>>, vector<8x128xf32>
      tpu.vector_store %arg4[%c0_61, %c0_62], %137 {strides = array<i32>} : memref<8x128xf32, #tpu.memory_space<vmem>>, vector<8x128xf32>,
    } else {
    }
    return
  }
  func.func @transform_0(%arg0: i32, %arg1: i32) -> (i32, i32, i32) {
    %c1_i32 = arith.constant 1 : i32
    %0 = arith.muli %arg0, %c1_i32 : i32
    %1 = arith.addi %0, %arg1 : i32
    %c0_i32 = arith.constant 0 : i32
    %c0_i32_0 = arith.constant 0 : i32
    %c0_i32_1 = arith.constant 0 : i32
    return %c0_i32, %1, %c0_i32_0 : i32, i32, i32
  }
  func.func @transform_1(%arg0: i32, %arg1: i32) -> (i32, i32) {
    %c1_i32 = arith.constant 1 : i32
    %0 = arith.muli %arg0, %c1_i32 : i32
    %1 = arith.addi %0, %arg1 : i32
    %c0_i32 = arith.constant 0 : i32
    %c0_i32_0 = arith.constant 0 : i32
    return %1, %c0_i32 : i32, i32
  }
  func.func @transform_2(%arg0: i32, %arg1: i32) -> (i32, i32) {
    %c0_i32 = arith.constant 0 : i32
    %c0_i32_0 = arith.constant 0 : i32
    return %arg0, %c0_i32 : i32, i32
  }
}

</mosaic_0001>

<bundles_post_ra>
// kernel: tpu_custom_call.1
= control target key start
LH: loop header
LB: loop body
LE: loop exit
PB: predicated region body
PF: predicated region fallthrough
CT: control target
= control target key end

     0   :  { %s1084_s0 = inlined_call_operand.hbm [shape: f32[2,16,128], index: 0, kind: input, shape index: {}]   ;;  %s1085_s1 = inlined_call_operand.hbm [shape: s32[16,128], index: 1, kind: input, shape index: {}]   ;;  %s1086_s2 = inlined_call_operand.hbm [shape: f32[16,128], index: 2, kind: output, shape index: {}]  }
   0x1   :  { %1087 = sst [smem:[#allocation17_spill]] %s1084_s0 }
   0x2   :  { %7 = vsyncpa [#allocation9], 0 }
   0x3   :  { %9 = vsyncpa [#allocation9 + $0x1], 0 }
   0x4   :  { %10 = vsyncpa [#allocation12], 0 }
   0x5   :  { %12 = vsyncpa [#allocation12 + $0x1], 0 }
   0x6   :  { %13 = vsyncpa [#allocation10], 0 }
   0x7   :  { %15 = vsyncpa [#allocation10 + $0x1], 0  ;;  %s842_s9 = smov 0   ;;  %s844_s10 = smov 0  }
   0x8   :  { %s846_s11 = smov 0   ;;  %s848_s12 = smov 0  }
   0x9   :  { %s850_s13 = smov 0   ;;  %s852_s14 = smov 0  }
   0xa LB: > { %s557_s15 = sadd.s32 4294967295, %s816_s14   ;;  %s558_s16 = sadd.s32 4294967294, %s816_s14   ;;  %s816_s14 = sphi %s852_s14, %s21_s14   ;;  %s812_s13 = sphi %s850_s13, %s1099_s13   ;;  %s808_s12 = sphi %s848_s12, %s1098_s12   ;;  %s804_s11 = sphi %s846_s11, %s1097_s11   ;;  %s800_s10 = sphi %s844_s10, %s1096_s10   ;;  %s796_s9 = sphi %s842_s9, %s1095_s9  }
   0xb   : > { %s33_s17 = sadd.s32 1, %s812_s13  ;;  %s42_s18 = sadd.s32 1, %s804_s11 }
   0xc   : > { %p35_p0 = scmp.ge.s32.totalorder %s33_s17, 2  ;;  %p49_p1 = scmp.ne.s32.totalorder %s804_s11, %s800_s10 }
   0xd   : > { %p50_p2 = scmp.eq.s32.totalorder %s816_s14, 0  ;;  %p55_p3 = scmp.ne.s32.totalorder %s800_s10, %s796_s9 }
   0xe   : > { %s1101_s17 = smov (%p35_p0, %s33_s17), 0  ;;  %p56_p5 = scmp.eq.s32.totalorder %s557_s15, 0 }
   0xf   : > { %p883_p4 = por %p50_p2, %p49_p1  ;;  %s39_s20 = ssub.s32 %s812_s13, %s1101_s17 }
  0x10   : > { %p107_p6 = scmp.eq.s32.totalorder %s557_s15, 1  ;;  %p40_p7 = scmp.eq.s32.totalorder %s39_s20, 0 }
  0x11   : > { %p889_p8 = por %p56_p5, %p55_p3  ;;  %p113_p10 = scmp.eq.s32.totalorder %s558_s16, 1 }
  0x12   : > { %p893_p9 = por %p107_p6, %p49_p1  ;;  %p560_p12 = scmp.ge.s32.totalorder %s816_s14, 2 }
  0x13   : > { %s898_s23 = scalar_select %p40_p7, %s804_s11, %s42_s18  }
  0x14   : > { %p900_p11 = por %p113_p10, %p55_p3  ;;  %p610_p13 = scmp.lt.s32.totalorder %s816_s14, 2 }
  0x15   : > { %s907_s25 = sand.u32 1, %s804_s11   ;;  %s562_s27 = sshll.u32 %s812_s13, 7 }
  0x16   : > { %s561_s26 = sshll.u32 %s907_s25, 4  ;;  %s1092_s0 = sld [smem:[#allocation17_spill]] }
  0x17   : > { %s137_s3 = scalar_lea.vmem [#allocation8], %s561_s26  ;;  %p918_p0 = pnand %p610_p13, %p883_p4 }
  0x18   : > { %s144_s4 = sshll.u32 %s137_s3, 4  ;;  %s134_s6 = scalar_lea.sflag [#allocation9], %s907_s25  ;;  %s145_s4 = int_to_ptr.vmem [resolvable:$true] %s144_s4 }
  0x19   : > { %p678_p1 = pneg %p918_p0  ;;  %s689_s7 = scalar_lea.vmem %s145_s4, 256 }
  0x1a   : > { %p690_p2 = scmp.ne.s32.totalorder %s145_s4, %s689_s7  ;;  %s818_s8 = smov [#allocation8]  }
  0x1b   : > { %s694_s15 = sshll.u32 %s818_s8, 4  ;;  %s695_s15 = int_to_ptr.vmem [resolvable:$false] %s694_s15 }
  0x1c   : > { %s143_s30 = scalar_lea.hbm %s1092_s0, %s562_s27  ;;  %p692_p3 = pnand %p690_p2, %p678_p1 }
  0x1d   : > { %s696_s16 = scalar_lea.vmem %s695_s15, 512  ;;  %p697_p6 = scmp.lt.s32.totalorder %s145_s4, %s695_s15 }
  0x1e   : > { %p693_p5 = pneg %p692_p3  ;;  %p698_p4 = scmp.lt.s32.totalorder %s696_s16, %s689_s7 }
  0x20   : > { %p699_p7 = por %p698_p4, %p697_p6 }
  0x22   : > { %p700_p10 = pnand %p699_p7, %p693_p5 }
  0x24   : > { %703 = shalt.err (!%p700_p10)
}
  0x25   : > { %s819_s18 = smov 256   ;;  %s820_s19 = smov 128  }
  0x26   : > { %s821_s20 = smov 8   ;;  %p565_p13 = scmp.ge.s32.totalorder %s816_s14, 1 }
  0x27   : > { %602 = dma.hbm_to_vmem [thread:$0]  (!%p918_p0), %s143_s30, 256, %s145_s4, %s134_s6, %s819_s18, %s820_s19, %s821_s20  }
  0x28   : > { %p171_p2 = scmp.lt.s32.totalorder %s816_s14, 3  ;;  %s563_s26 = sshll.u32 %s907_s25, 3 }
  0x29   : > { %s164_s7 = scalar_lea.hbm %s1085_s1, %s562_s27  ;;  %s158_s8 = scalar_lea.vmem [#allocation11], %s563_s26 }
  0x2a   : > { %p933_p3 = pnand %p565_p13, %p171_p2  ;;  %s166_s15 = sshll.u32 %s158_s8, 4  ;;  %s167_s15 = int_to_ptr.vmem [resolvable:$true] %s166_s15 }
  0x2b   : > { %s155_s16 = scalar_lea.sflag [#allocation12], %s907_s25  ;;  %s717_s0 = scalar_lea.vmem %s167_s15, 128 }
  0x2c   : > { %p718_p5 = scmp.ne.s32.totalorder %s167_s15, %s717_s0  ;;  %s822_s30 = smov [#allocation11]  }
  0x2d   : > { %s722_s4 = sshll.u32 %s822_s30, 4  ;;  %s723_s4 = int_to_ptr.vmem [resolvable:$false] %s722_s4 }
  0x2e   : > { %p720_p6 = pnand %p718_p5, %p678_p1  ;;  %s724_s6 = scalar_lea.vmem %s723_s4, 256 }
  0x2f   : > { %p725_p7 = scmp.lt.s32.totalorder %s167_s15, %s723_s4  ;;  %p726_p10 = scmp.lt.s32.totalorder %s724_s6, %s717_s0 }
  0x30   : > { %p721_p4 = pneg %p720_p6 }
  0x31   : > { %p727_p13 = por %p726_p10, %p725_p7 }
  0x33   : > { %p728_p2 = pnand %p727_p13, %p721_p4 }
  0x35   : > { %731 = shalt.err (!%p728_p2)
}
  0x36   : > { %605 = dma.hbm_to_vmem [thread:$0]  (!%p918_p0), %s164_s7, 128, %s167_s15, %s155_s16  }
  0x37   : > { %175 = sbr.rel (%p933_p3) target bundleno = 781 (0x30d), region = 28  ;;  %s951_s25 = sand.u32 (!%p933_p3), 1, %s800_s10  }
  0x38   : > { %s566_s27 = sshll.u32 (!%p933_p3), %s951_s25, 4  ;;  %s178_s18 = scalar_lea.sflag (!%p933_p3), [#allocation9], %s951_s25 }
  0x39   : > { %s181_s19 = scalar_lea.vmem (!%p933_p3), [#allocation8], %s566_s27 }
  0x3c   : > { %783 = dma.done.wait (%p889_p8), %s178_s18, 256  }
  0x3d   : > { %785 = vsyncadd (%p889_p8), %s178_s18, 4294967040  ;;  %s567_s0 = sshll.u32 %s951_s25, 3  ;;  %s187_s5 = scalar_lea.sflag [#allocation12], %s951_s25 }
  0x3e   : > { %s963_s20 = scalar_lea.vmem [#allocation11], %s567_s0 }
  0x3f   : > { %787 = dma.done.wait (%p889_p8), %s187_s5, 128  }
  0x40   : > { %789 = vsyncadd (%p889_p8), %s187_s5, 4294967168  ;;  %v233_v0 = vlaneseq  ;;  %s570_s26 = sshll.u32 %s808_s12, 10  ;;  %v972_v6 = vld [vmem:[%s181_s19] sm:$0xff]  ;;  %v569_v8 = vld [vmem:[%s181_s19 + $0x8] sm:$0xff]  ;;  %vm222_vm1 = vcmask 0   ;;  %v824_v12 = vmov 0  }
  0x41   : > { %v240_v2 = vstv %s570_s26  ;;  %v823_v11 = vmov -3.4028235e+38   ;;  %666 = vset.pattern.permute.xlu1 %v824_v12  ;;  %667 = vset.pattern.permute.xlu0 %v824_v12  ;;  %v825_v13 = vmov 0.0   ;;  %v232_v45 = vld [vmem:[%s963_s20] sm:$0xff]  ;;  %s578_s15 = sshll.u32 %s808_s12, 7  ;;  %s215_s16 = scalar_lea.vmem [#allocation13], %s567_s0 }
  0x42   : > { %v234_v1 = vshrl.u32 %v233_v0, 7  ;;  %v970_v3 = vand.u32 127, %v233_v0  ;;  %223 = vst.msk [vmem:[#allocation2] sm:$0x1] %vm222_vm1, %v823_v11  ;;  %224 = vst.msk [vmem:[#allocation3] sm:$0x1] %vm222_vm1, %v823_v11  ;;  %s1042_s27 = scalar_lea.hbm %s1086_s2, %s578_s15 }
  0x43   : > { %225 = vst.msk [vmem:[#allocation4] sm:$0x1] %vm222_vm1, %v825_v13  ;;  %226 = vst.msk [vmem:[#allocation5] sm:$0x1] %vm222_vm1, %v825_v13  ;;  %vm333_vm2 = vcmp.eq.s32.totalorder %v232_v45, 1  ;;  %s454_s30 = sshll.u32 %s215_s16, 4  ;;  %s455_s30 = int_to_ptr.vmem [resolvable:$true] %s454_s30 }
  0x44   : > { %v239_v4 = vmul.u32 128, %v234_v1  ;;  %227 = vst.msk [vmem:[#allocation6] sm:$0x1] %vm222_vm1, %v825_v13  ;;  %228 = vst.msk [vmem:[#allocation7] sm:$0x1] %vm222_vm1, %v825_v13  ;;  %v273_v29 = vsub.s32 0, %v234_v1  ;;  %v334_v47 = vsel %vm333_vm2, %v569_v8, %v972_v6 }
  0x45   : > { %vm367_vm4 = vcmp.eq.s32.totalorder %v970_v3, 0  ;;  %vm379_vm5 = vcmp.eq.s32.totalorder %v970_v3, 1  ;;  %vm391_vm6 = vcmp.eq.s32.totalorder %v970_v3, 2  ;;  %vm403_vm7 = vcmp.eq.s32.totalorder %v970_v3, 3  ;;  %s441_s18 = scalar_lea.sflag [#allocation10], %s951_s25  ;;  %s732_s19 = scalar_lea.vmem %s455_s30, 128 }
  0x46   : > { %v241_v5 = vadd.s32 %v240_v2, %v239_v4  ;;  %vm415_vm8 = vcmp.eq.s32.totalorder %v970_v3, 4  ;;  %vm427_vm9 = vcmp.eq.s32.totalorder %v970_v3, 5  ;;  %p733_p8 = scmp.ne.s32.totalorder %s455_s30, %s732_s19  ;;  %s826_s12 = smov [#allocation13]  }
  0x47   : > { %s736_s0 = sshll.u32 %s826_s12, 4  ;;  %s737_s0 = int_to_ptr.vmem [resolvable:$false] %s736_s0 }
  0x48   : > { %v975_v7 = vadd.s32 %v241_v5, %v970_v3  ;;  %p734_p0 = pnand %p733_p8, %p893_p9  ;;  %s738_s5 = scalar_lea.vmem %s737_s0, 256 }
  0x49   : > { %v989_v28 = vld [vmem:[#allocation2] sm:$0x1]  ;;  %v994_v32 = vld [vmem:[#allocation3] sm:$0x1]  ;;  %p739_p3 = scmp.lt.s32.totalorder %s455_s30, %s737_s0  ;;  %p740_p5 = scmp.lt.s32.totalorder %s738_s5, %s732_s19 }
  0x4a   : > { %vm243_vm0 = vcmp.lt.s32.totalorder %v975_v7, 8  ;;  %p735_p1 = pneg %p734_p0 }
  0x4b   : > { %v244_v9 = vsel %vm243_vm0, %v972_v6, -3.4028235e+38  ;;  %v245_v10 = vsel %vm243_vm0, %v569_v8, -3.4028235e+38  ;;  %v336_v49 = vsel %vm243_vm0, %v334_v47, 0.0  ;;  %vm350_vm3 = vmand %vm243_vm0, %vm333_vm2  ;;  %p741_p6 = por %p740_p5, %p739_p3 }
  0x4c   : > { %246 = vmax.xlane.f32.xlu0 %v244_v9  ;;  %v351_v52 = vsel %vm350_vm3, 1.0, %v825_v13 }
  0x4d   : > { %p742_p4 = pnand %p741_p6, %p735_p1 }
  0x50   : > { %256 = vmax.xlane.f32.xlu0 %v245_v10 }
  0xd5   : > { %v247_v14 = vpop.xlane.xlu0 %246 }
  0xd6   : > { %v248_v15 = vrot.slane %v247_v14, 4 }
  0xd8   : > { %v249_v16 = vmax.f32 %v247_v14, %v248_v15 }
  0xd9   : > { %v257_v17 = vpop.xlane.xlu0 %256 }
  0xda   : > { %v250_v18 = vrot.slane %v249_v16, 2  ;;  %v258_v19 = vrot.slane %v257_v17, 4 }
  0xdc   : > { %v259_v20 = vmax.f32 %v257_v17, %v258_v19  ;;  %v251_v21 = vmax.f32 %v249_v16, %v250_v18 }
  0xde   : > { %v260_v22 = vrot.slane %v259_v20, 2  ;;  %v252_v23 = vrot.slane %v251_v21, 1 }
  0xe0   : > { %v253_v24 = vmax.f32 %v251_v21, %v252_v23  ;;  %v261_v25 = vmax.f32 %v259_v20, %v260_v22  ;;  %v296_v23 = vld [vmem:[#allocation4] sm:$0x1] }
  0xe2   : > { %581 = vpush %v253_v24  ;;  %v262_v26 = vrot.slane %v261_v25, 1 }
  0xe4   : > { %v263_v27 = vmax.f32 %v261_v25, %v262_v26 }
  0xe6   : > { %583 = vpush %v263_v27  ;;  %v314_v27 = vld [vmem:[#allocation5] sm:$0x1] }
 0x113   : > { %s582_s21 = spop %581 }
 0x114   : > { %v255_v30 = vstv %s582_s21 }
 0x115   : > { %v992_v31 = vmax.f32 %v989_v28, %v255_v30 }
 0x117   : > { %v297_v33 = vsub.f32 %v989_v28, %v992_v31  ;;  %331 = vst.msk [vmem:[#allocation2] sm:$0x1] %vm222_vm1, %v992_v31  ;;  %s584_s28 = spop %583  ;;  %v274_v34 = vrot.slane %v992_v31, %v273_v29  ;;  %v335_v28 = vld [vmem:[#allocation6] sm:$0x1] }
 0x118   : > { %v265_v35 = vstv %s584_s28 }
 0x119   : > { %v1002_v36 = vmax.f32 %v994_v32, %v265_v35  ;;  %276 = vperm.xlu1 %666, %v274_v34   ;;  %v298_v20 = vmul.f32 1.442695, %v297_v33  ;;  %v349_v35 = vld [vmem:[#allocation7] sm:$0x1] }
 0x11b   : > { %v315_v37 = vsub.f32 %v994_v32, %v1002_v36  ;;  %332 = vst.msk [vmem:[#allocation3] sm:$0x1] %vm222_vm1, %v1002_v36  ;;  %v287_v38 = vrot.slane %v1002_v36, %v273_v29 }
 0x11d   : > { %289 = vperm.xlu1 %666, %v287_v38   ;;  %v316_v21 = vmul.f32 1.442695, %v315_v37 }
 0x11e   : > { %v571_v54 = vld [vmem:[#allocation2] ss:$0 sm:$0xff] }
 0x122   : > { %v572_v53 = vld [vmem:[#allocation3] ss:$0 sm:$0xff] }
 0x194   : > { %v277_v39 = vpop.permute.xlu1 %276 }
 0x195   : > { %v279_v40 = vsub.f32 %v972_v6, %v277_v39 }
 0x197   : > { %v280_v41 = vmul.f32 1.442695, %v279_v40 }
 0x198   : > { %v290_v42 = vpop.permute.xlu1 %289 }
 0x199   : > { %668 = vpow2.f32 %v280_v41  ;;  %v292_v43 = vsub.f32 %v569_v8, %v290_v42 }
 0x19b   : > { %v293_v44 = vmul.f32 1.442695, %v292_v43 }
 0x19d   : > { %670 = vpow2.f32 %v293_v44 }
 0x19e   : > { %672 = vpow2.f32 %v298_v20 }
 0x19f   : > { %674 = vpow2.f32 %v316_v21 }
 0x1a6   : > { %v669_v46 = vpop.eup %668 }
 0x1a7   : > { %v282_v48 = vsel %vm243_vm0, %v669_v46, 0.0 }
 0x1a8   : > { %301 = vadd.xlane.f32.xlu0 %v282_v48 }
 0x1aa   : > { %v671_v50 = vpop.eup %670 }
 0x1ab   : > { %v295_v51 = vsel %vm243_vm0, %v671_v50, 0.0  ;;  %v673_v22 = vpop.eup %672 }
 0x1ac   : > { %337 = vadd.xlane.f32.xlu0 %v336_v49  ;;  %319 = vadd.xlane.f32.xlu1 %v295_v51  ;;  %v300_v24 = vmul.f32 %v673_v22, %v296_v23  ;;  %v675_v25 = vpop.eup %674 }
 0x1ad   : > { %v318_v30 = vmul.f32 %v675_v25, %v314_v27 }
 0x1b0   : > { %352 = vadd.xlane.f32.xlu0 %v351_v52 }
 0x1bd   : > { %387 = vperm.xlu1 %666, %v572_v53  }
 0x1c6   : > { %375 = vperm.xlu0 %667, %v571_v54  }
 0x231   : > { %v302_v55 = vpop.xlane.xlu0 %301 }
 0x232   : > { %v303_v56 = vrot.slane %v302_v55, 4 }
 0x234   : > { %v304_v57 = vadd.f32 %v303_v56, %v302_v55 }
 0x235   : > { %v338_v58 = vpop.xlane.xlu0 %337  ;;  %v320_v59 = vpop.xlane.xlu1 %319 }
 0x236   : > { %v305_v60 = vrot.slane %v304_v57, 2  ;;  %v339_v61 = vrot.slane %v338_v58, 4  ;;  %v321_v62 = vrot.slane %v320_v59, 4 }
 0x238   : > { %v340_v63 = vadd.f32 %v339_v61, %v338_v58  ;;  %v322_v0 = vadd.f32 %v321_v62, %v320_v59  ;;  %v306_v1 = vadd.f32 %v305_v60, %v304_v57 }
 0x239   : > { %v353_v2 = vpop.xlane.xlu0 %352  ;;  %v388_v42 = vpop.permute.xlu1 %387 }
 0x23a   : > { %v341_v4 = vrot.slane %v340_v63, 2  ;;  %v323_v5 = vrot.slane %v322_v0, 2  ;;  %v354_v6 = vrot.slane %v353_v2, 4  ;;  %v307_v7 = vrot.slane %v306_v1, 1 }
 0x23c   : > { %v355_v8 = vadd.f32 %v354_v6, %v353_v2  ;;  %v308_v9 = vadd.f32 %v307_v7, %v306_v1  ;;  %v324_v10 = vadd.f32 %v323_v5, %v322_v0  ;;  %v342_v11 = vadd.f32 %v341_v4, %v340_v63 }
 0x23e   : > { %v356_v12 = vrot.slane %v355_v8, 2  ;;  %585 = vpush %v308_v9  ;;  %v325_v13 = vrot.slane %v324_v10, 1  ;;  %v343_v14 = vrot.slane %v342_v11, 1 }
 0x240   : > { %v326_v15 = vadd.f32 %v325_v13, %v324_v10  ;;  %v344_v16 = vadd.f32 %v343_v14, %v342_v11  ;;  %v357_v17 = vadd.f32 %v356_v12, %v355_v8 }
 0x241   : > { %v376_v43 = vpop.permute.xlu0 %375 }
 0x242   : > { %587 = vpush %v326_v15  ;;  %v358_v18 = vrot.slane %v357_v17, 1  ;;  %v378_v44 = vsel %vm367_vm4, %v376_v43, 0.0 }
 0x243   : > { %589 = vpush %v344_v16  ;;  %v390_v46 = vsel %vm379_vm5, %v388_v42, %v378_v44 }
 0x244   : > { %v359_v19 = vadd.f32 %v358_v18, %v357_v17 }
 0x246   : > { %591 = vpush %v359_v19 }
 0x26f   : > { %s586_s29 = spop %585 }
 0x270   : > { %v310_v26 = vstv %s586_s29 }
 0x271   : > { %v311_v29 = vadd.f32 %v310_v26, %v300_v24 }
 0x273   : > { %313 = vst.msk [vmem:[#allocation4] sm:$0x1] %vm222_vm1, %v311_v29  ;;  %s588_s3 = spop %587 }
 0x274   : > { %v328_v31 = vstv %s588_s3  ;;  %s590_s7 = spop %589 }
 0x275   : > { %v329_v33 = vadd.f32 %v328_v31, %v318_v30  ;;  %v346_v34 = vstv %s590_s7 }
 0x276   : > { %v347_v32 = vadd.f32 %v346_v34, %v335_v28 }
 0x277   : > { %330 = vst.msk [vmem:[#allocation5] sm:$0x1] %vm222_vm1, %v329_v33  ;;  %s592_s8 = spop %591 }
 0x278   : > { %348 = vst.msk [vmem:[#allocation6] sm:$0x1] %vm222_vm1, %v347_v32  ;;  %v361_v36 = vstv %s592_s8 }
 0x279   : > { %v362_v37 = vadd.f32 %v361_v36, %v349_v35 }
 0x27a   : > { %v573_v38 = vld [vmem:[#allocation4] ss:$0 sm:$0xff] }
 0x27b   : > { %363 = vst.msk [vmem:[#allocation7] sm:$0x1] %vm222_vm1, %v362_v37  ;;  %399 = vperm.xlu1 %666, %v573_v38  }
 0x27e   : > { %v574_v39 = vld [vmem:[#allocation5] ss:$0 sm:$0xff] }
 0x27f   : > { %v575_v40 = vld [vmem:[#allocation6] ss:$0 sm:$0xff]  ;;  %411 = vperm.xlu0 %667, %v574_v39  }
 0x280   : > { %423 = vperm.xlu1 %666, %v575_v40  }
 0x282   : > { %v576_v41 = vld [vmem:[#allocation7] ss:$0 sm:$0xff] }
 0x283   : > { %435 = vperm.xlu0 %667, %v576_v41  }
 0x2f6   : > { %v400_v45 = vpop.permute.xlu1 %399 }
 0x2f7   : > { %v402_v47 = vsel %vm391_vm6, %v400_v45, %v390_v46 }
 0x2fa   : > { %v412_v48 = vpop.permute.xlu0 %411 }
 0x2fb   : > { %v414_v49 = vsel %vm403_vm7, %v412_v48, %v402_v47  ;;  %v424_v50 = vpop.permute.xlu1 %423 }
 0x2fc   : > { %v426_v51 = vsel %vm415_vm8, %v424_v50, %v414_v49 }
 0x2fe   : > { %v436_v52 = vpop.permute.xlu0 %435 }
 0x2ff   : > { %v438_v53 = vsel %vm427_vm9, %v436_v52, %v426_v51 }
 0x300   : > { %439 = vst [vmem:[%s215_s16] sm:$0xff] %v438_v53 }
 0x301   : > { %745 = shalt.err (!%p742_p4)
}
 0x302   : > { %s746_s20 = scalar_lea.hbm %s1042_s27, 128  ;;  %s750_s21 = scalar_lea.hbm %s1086_s2, 256 }
 0x303   : > { %p747_p7 = scmp.ne.s32.totalorder %s1042_s27, %s746_s20  ;;  %p751_p2 = scmp.lt.s32.totalorder %s1042_s27, %s1086_s2 }
 0x304   : > { %p752_p8 = scmp.lt.s32.totalorder %s750_s21, %s746_s20 }
 0x305   : > { %p748_p10 = pnand %p747_p7, %p893_p9 }
 0x306   : > { %p753_p0 = por %p752_p8, %p751_p2 }
 0x307   : > { %p749_p13 = pneg %p748_p10 }
 0x309   : > { %p754_p1 = pnand %p753_p0, %p749_p13 }
 0x30b   : > { %757 = shalt.err (!%p754_p1)
}
 0x30c   : > { %597 = dma.vmem_to_hbm [thread:$0]  (%p893_p9), %s455_s30, 128, %s1042_s27, %s441_s18  }
 0x30d PF: > { %s466_s3 = sand.u32 1, %s796_s9   ;;  %p607_p3 = pnand %p560_p12, %p900_p11 }
 0x30e   : > { %s467_s7 = scalar_lea.sflag [#allocation10], %s466_s3 }
 0x30f   : > { %p608_p5 = pneg %p607_p3 }
 0x311   : > { %791 = dma.done.wait (%p608_p5), %s467_s7, 128  }
 0x312   : > { %793 = vsyncadd (%p608_p5), %s467_s7, 4294967168  ;;  %s21_s14 = sadd.s32 1, %s816_s14   ;;  %s1095_s9 = smov %s800_s10 }
 0x313   : > { %p18_p6 = scmp.ge.s32.totalorder %s21_s14, 4   ;;  %s1096_s10 = smov %s804_s11 }
 0x314   : > { %s1097_s11 = smov %s898_s23  ;;  %s1098_s12 = smov %s812_s13 }
 0x315   : > { %s1099_s13 = smov %s1101_s17  ;;  %20 = sbr.rel (!%p18_p6) target bundleno = 10 (0xa), region = 95 }
 0x31a   :  { %472 = vsyncpa [#allocation9], 1 }
 0x31b   :  { %474 = vsyncpa [#allocation9 + $0x1], 1 }
 0x31c   :  { %475 = vsyncpa [#allocation12], 1 }
 0x31d   :  { %477 = vsyncpa [#allocation12 + $0x1], 1 }
 0x31e   :  { %478 = vsyncpa [#allocation10], 1 }
 0x31f   :  { %480 = vsyncpa [#allocation10 + $0x1], 1 }

</bundles_post_ra>
